<compile_context>
chip_gen: v7x
topology: tpu7x:2x2x1
jax: 0.10.0
libtpu: 0.0.40
codegen_flags: <defaults>
</compile_context>

<pallas_src>
import jax
import jax.numpy as jnp
from jax.experimental import pallas as pl
from jax.experimental.pallas import tpu as pltpu


D_IN = 28 * 28      # 784 (kept un-padded; block dim == full array dim is legal)
HIDDEN = 128
NUM_CLASSES = 10
C_PAD = 128         # lane-dense padded class width


def _mlp_kernel(x_ref, w1_ref, b1_ref, w2_ref, b2_ref, out_ref):
    # x_ref:  (TB, 784) f32    w1_ref: (784, 128) bf16   b1_ref: (1, 128) f32
    # w2_ref: (128, 128) bf16  b2_ref: (1, 128) f32 (pad lanes = -1e30)
    # out_ref: (TB, 128) f32

    # fc1 + bias + relu: cast x to bf16 in-register for native MXU rate,
    # accumulate in f32; activations stay f32.
    x = x_ref[...].astype(jnp.bfloat16)
    h = jnp.dot(x, w1_ref[...], preferred_element_type=jnp.float32)
    h = jnp.maximum(h + b1_ref[...], 0.0)

    # dropout: identity in eval mode
    # TODO(synk): training-mode dropout (Bernoulli mask via pltpu.prng_random_bits)

    # fc2 over the 128-wide padded class slab.  Padded lanes get bias -1e30,
    # so no in-kernel masking is needed before softmax.
    logits = jnp.dot(h.astype(jnp.bfloat16), w2_ref[...],
                     preferred_element_type=jnp.float32) + b2_ref[...]

    # Numerically stable softmax along the class lanes (pad lanes exp to 0).
    m = jnp.max(logits, axis=-1, keepdims=True)
    e = jnp.exp(logits - m)
    s = jnp.sum(e, axis=-1, keepdims=True)
    out_ref[...] = (e * pl.reciprocal(s, approx=True)).astype(out_ref.dtype)


def _round_up(a, m):
    return (a + m - 1) // m * m


def simple_nn_forward(x_nchw, params, *, tile_b=1024):
    """x_nchw: (B, 1, 28, 28) float32.  Returns (B, 10) softmax probabilities."""
    w1, b1, w2, b2 = params
    B = x_nchw.shape[0]

    # --- wrapper-side layout plumbing (flatten only; no pad/cast of x) ---
    x = x_nchw.reshape(B, D_IN).astype(jnp.float32)   # metadata-only reshape

    # Weights/biases are tiny and VMEM-resident: cast weights to bf16 once,
    # zero-pad w2's class columns, and set b2's pad lanes to -1e30 so padded
    # logits vanish under softmax.
    w1p = w1.astype(jnp.bfloat16)                                    # (784, 128)
    b1p = b1.reshape(1, HIDDEN).astype(jnp.float32)                  # (1, 128)
    w2p = jnp.pad(w2.astype(jnp.float32),
                  ((0, 0), (0, C_PAD - NUM_CLASSES))).astype(jnp.bfloat16)
    b2p = jnp.pad(b2.reshape(1, NUM_CLASSES).astype(jnp.float32),
                  ((0, 0), (0, C_PAD - NUM_CLASSES)),
                  constant_values=-1e30)

    # --- batch tiling ---
    TB = min(tile_b, _round_up(B, 8))
    B_pad = _round_up(B, TB)
    if B_pad != B:
        x = jnp.pad(x, ((0, B_pad - B), (0, 0)))
    grid = (B_pad // TB,)

    out = pl.pallas_call(
        _mlp_kernel,
        out_shape=jax.ShapeDtypeStruct((B_pad, C_PAD), jnp.float32),
        grid_spec=pltpu.PrefetchScalarGridSpec(
            num_scalar_prefetch=0,
            grid=grid,
            in_specs=[
                pl.BlockSpec((TB, D_IN), lambda i: (i, 0)),       # x tiles move
                pl.BlockSpec((D_IN, HIDDEN), lambda i: (0, 0)),   # weights resident
                pl.BlockSpec((1, HIDDEN), lambda i: (0, 0)),
                pl.BlockSpec((HIDDEN, C_PAD), lambda i: (0, 0)),
                pl.BlockSpec((1, C_PAD), lambda i: (0, 0)),
            ],
            out_specs=pl.BlockSpec((TB, C_PAD), lambda i: (i, 0)),
        ),
        compiler_params=pltpu.CompilerParams(
            dimension_semantics=("parallel",),   # megacore sharding on v7x
        ),
    )(x, w1p, b1p, w2p, b2p)

    return out[:B, :NUM_CLASSES]


def init_params(key):
    """Deterministic param init matching nn.Linear shapes (stored transposed)."""
    D, H, C = D_IN, HIDDEN, NUM_CLASSES
    k1, k2, k3, k4 = jax.random.split(key, 4)
    lim1 = 1.0 / jnp.sqrt(D)
    lim2 = 1.0 / jnp.sqrt(H)
    w1 = jax.random.uniform(k1, (D, H), jnp.float32, -lim1, lim1)
    b1 = jax.random.uniform(k2, (H,), jnp.float32, -lim1, lim1)
    w2 = jax.random.uniform(k3, (H, C), jnp.float32, -lim2, lim2)
    b2 = jax.random.uniform(k4, (C,), jnp.float32, -lim2, lim2)
    return w1, b1, w2, b2


if __name__ == "__main__":
    key = jax.random.PRNGKey(0)
    kx, kp = jax.random.split(key)

    B = 32
    x = jax.random.normal(kx, (B, 1, 28, 28), jnp.float32)  # layout: NCHW
    params = init_params(kp)

    # Small tile so the test exercises a multi-step batch grid (grid=(4,)).
    out = simple_nn_forward(x, params, tile_b=8)
    out = jax.block_until_ready(out)

    # Reference check in plain f32 JAX (kernel uses bf16 MXU inputs, so use a
    # bf16-appropriate tolerance).
    w1, b1, w2, b2 = params
    xf = x.reshape(B, D_IN)
    h = jnp.maximum(xf @ w1 + b1, 0.0)
    ref = jax.nn.softmax(h @ w2 + b2, axis=1)

    assert out.shape == (B, NUM_CLASSES)
    assert jnp.allclose(out, ref, atol=1e-2, rtol=1e-2)
    assert jnp.allclose(jnp.sum(out, axis=1), 1.0, atol=1e-2)

    print("KERNEL_OK")
</pallas_src>

<mosaic_0001>
module attributes {stable_mosaic.version = 11 : i64} {
  func.func @_mlp_kernel(%arg0: i32, %arg1: memref<8x784xf32, #tpu.memory_space<vmem>>, %arg2: memref<784x128xbf16, #tpu.memory_space<vmem>>, %arg3: memref<1x128xf32, #tpu.memory_space<vmem>>, %arg4: memref<128x128xbf16, #tpu.memory_space<vmem>>, %arg5: memref<1x128xf32, #tpu.memory_space<vmem>>, %arg6: memref<8x128xf32, #tpu.memory_space<vmem>>) attributes {dimension_semantics = [#tpu.dimension_semantics<parallel>], iteration_bounds = array<i64: 4>, scalar_prefetch = 0 : i64, scratch_operands = 0 : i64, tpu.core_type = #tpu.core_type<tc>, window_params = [{transform_indices = @transform_0, window_bounds = array<i64: 8, 784>}, {pipeline_mode = #tpu.pipeline_mode<synchronous>, transform_indices = @transform_1, window_bounds = array<i64: 784, 128>}, {pipeline_mode = #tpu.pipeline_mode<synchronous>, transform_indices = @transform_2, window_bounds = array<i64: 1, 128>}, {pipeline_mode = #tpu.pipeline_mode<synchronous>, transform_indices = @transform_3, window_bounds = array<i64: 128, 128>}, {pipeline_mode = #tpu.pipeline_mode<synchronous>, transform_indices = @transform_4, window_bounds = array<i64: 1, 128>}, {transform_indices = @transform_5, window_bounds = array<i64: 8, 128>}]} {
    %c0 = arith.constant 0 : index
    %c0_0 = arith.constant 0 : index
    %0 = vector.load %arg1[%c0, %c0_0] : memref<8x784xf32, #tpu.memory_space<vmem>>, vector<8x784xf32>
    %1 = arith.truncf %0 : vector<8x784xf32> to vector<8x784xbf16>
    %c0_1 = arith.constant 0 : index
    %c0_2 = arith.constant 0 : index
    %2 = vector.load %arg2[%c0_1, %c0_2] : memref<784x128xbf16, #tpu.memory_space<vmem>>, vector<784x128xbf16>
    %cst = arith.constant dense<0.000000e+00> : vector<8x128xf32>
    %3 = tpu.matmul %1, %2, %cst {dimension_numbers = #tpu.dot_dimension_numbers<[1], [0], [0], [1], [0, 0, 1, 1], [], []>} : vector<8x784xbf16>, vector<784x128xbf16>, vector<8x128xf32> -> vector<8x128xf32>
    %c0_3 = arith.constant 0 : index
    %c0_4 = arith.constant 0 : index
    %4 = vector.load %arg3[%c0_3, %c0_4] : memref<1x128xf32, #tpu.memory_space<vmem>>, vector<1x128xf32>
    %5 = vector.broadcast %4 : vector<1x128xf32> to vector<8x128xf32>
    %6 = arith.addf %3, %5 : vector<8x128xf32>
    %cst_5 = arith.constant 0.000000e+00 : f32
    %7 = vector.broadcast %cst_5 : f32 to vector<8x128xf32>
    %8 = arith.maximumf %6, %7 : vector<8x128xf32>
    %9 = arith.truncf %8 : vector<8x128xf32> to vector<8x128xbf16>
    %c0_6 = arith.constant 0 : index
    %c0_7 = arith.constant 0 : index
    %10 = vector.load %arg4[%c0_6, %c0_7] : memref<128x128xbf16, #tpu.memory_space<vmem>>, vector<128x128xbf16>
    %cst_8 = arith.constant dense<0.000000e+00> : vector<8x128xf32>
    %11 = tpu.matmul %9, %10, %cst_8 {dimension_numbers = #tpu.dot_dimension_numbers<[1], [0], [0], [1], [0, 0, 1, 1], [], []>} : vector<8x128xbf16>, vector<128x128xbf16>, vector<8x128xf32> -> vector<8x128xf32>
    %c0_9 = arith.constant 0 : index
    %c0_10 = arith.constant 0 : index
    %12 = vector.load %arg5[%c0_9, %c0_10] : memref<1x128xf32, #tpu.memory_space<vmem>>, vector<1x128xf32>
    %13 = vector.broadcast %12 : vector<1x128xf32> to vector<8x128xf32>
    %14 = arith.addf %11, %13 : vector<8x128xf32>
    %cst_11 = arith.constant dense<0xFF800000> : vector<8xf32>
    %15 = vector.multi_reduction <maximumf>, %14, %cst_11 [1] : vector<8x128xf32> to vector<8xf32>
    %16 = vector.shape_cast %15 : vector<8xf32> to vector<8x1xf32>
    %17 = vector.broadcast %16 : vector<8x1xf32> to vector<8x128xf32>
    %18 = arith.subf %14, %17 : vector<8x128xf32>
    %19 = math.exp %18 : vector<8x128xf32>
    %cst_12 = arith.constant dense<0.000000e+00> : vector<8xf32>
    %20 = vector.multi_reduction <add>, %19, %cst_12 [1] : vector<8x128xf32> to vector<8xf32>
    %21 = vector.shape_cast %20 : vector<8xf32> to vector<8x1xf32>
    %22 = tpu.reciprocal %21 {approx = true} : vector<8x1xf32> -> vector<8x1xf32>
    %23 = vector.broadcast %22 : vector<8x1xf32> to vector<8x128xf32>
    %24 = arith.mulf %19, %23 : vector<8x128xf32>
    %c0_13 = arith.constant 0 : index
    %c0_14 = arith.constant 0 : index
    %25 = vector.load %arg6[%c0_13, %c0_14] : memref<8x128xf32, #tpu.memory_space<vmem>>, vector<8x128xf32>
    tpu.vector_store %arg6[%c0_13, %c0_14], %24 {strides = array<i32>} : memref<8x128xf32, #tpu.memory_space<vmem>>, vector<8x128xf32>,
    return
  }
  func.func @transform_0(%arg0: i32) -> (i32, i32) {
    %c0_i32 = arith.constant 0 : i32
    %c0_i32_0 = arith.constant 0 : i32
    return %arg0, %c0_i32 : i32, i32
  }
  func.func @transform_1(%arg0: i32) -> (i32, i32) {
    %c0_i32 = arith.constant 0 : i32
    %c0_i32_0 = arith.constant 0 : i32
    %c0_i32_1 = arith.constant 0 : i32
    return %c0_i32, %c0_i32_0 : i32, i32
  }
  func.func @transform_2(%arg0: i32) -> (i32, i32) {
    %c0_i32 = arith.constant 0 : i32
    %c0_i32_0 = arith.constant 0 : i32
    %c0_i32_1 = arith.constant 0 : i32
    return %c0_i32, %c0_i32_0 : i32, i32
  }
  func.func @transform_3(%arg0: i32) -> (i32, i32) {
    %c0_i32 = arith.constant 0 : i32
    %c0_i32_0 = arith.constant 0 : i32
    %c0_i32_1 = arith.constant 0 : i32
    return %c0_i32, %c0_i32_0 : i32, i32
  }
  func.func @transform_4(%arg0: i32) -> (i32, i32) {
    %c0_i32 = arith.constant 0 : i32
    %c0_i32_0 = arith.constant 0 : i32
    %c0_i32_1 = arith.constant 0 : i32
    return %c0_i32, %c0_i32_0 : i32, i32
  }
  func.func @transform_5(%arg0: i32) -> (i32, i32) {
    %c0_i32 = arith.constant 0 : i32
    %c0_i32_0 = arith.constant 0 : i32
    return %arg0, %c0_i32 : i32, i32
  }
}

</mosaic_0001>

<bundles_post_ra>
// kernel: tpu_custom_call.1
= control target key start
LH: loop header
LB: loop body
LE: loop exit
PB: predicated region body
PF: predicated region fallthrough
CT: control target
= control target key end

     0   :  { %10 = vsyncpa [#allocation3], 0  ;;  %s1831_s0 = inlined_call_operand.hbm [shape: f32[32,784], index: 0, kind: input, shape index: {}]   ;;  %s1832_s1 = inlined_call_operand.hbm [shape: bf16[784,128], index: 1, kind: input, shape index: {}]   ;;  %s1833_s2 = inlined_call_operand.vmem [shape: f32[1,128], index: 2, kind: input, shape index: {}]   ;;  %s1834_s3 = inlined_call_operand.hbm [shape: bf16[128,128], index: 3, kind: input, shape index: {}]   ;;  %s1835_s4 = inlined_call_operand.vmem [shape: f32[1,128], index: 4, kind: input, shape index: {}]   ;;  %s1836_s5 = inlined_call_operand.hbm [shape: f32[32,128], index: 5, kind: output, shape index: {}]  }
   0x1   :  { %12 = vsyncpa [#allocation3 + $0x1], 0 }
   0x2   :  { %13 = vsyncpa [#allocation6], 0 }
   0x3   :  { %14 = vsyncpa [#allocation4], 0 }
   0x4   :  { %16 = vsyncpa [#allocation4 + $0x1], 0  ;;  %s1582_s18 = smov 0   ;;  %s1584_s19 = smov 0  }
   0x5   :  { %s1586_s20 = smov 0   ;;  %s1588_s21 = smov 0  }
   0x6 LB: > { %s1603_s22 = sadd.s32 4294967295, %s1542_s21   ;;  %s1074_s23 = sadd.s32 4294967294, %s1542_s21   ;;  %s1542_s21 = sphi %s1588_s21, %s1855_s21   ;;  %s1538_s20 = sphi %s1586_s20, %s1854_s20   ;;  %s1534_s19 = sphi %s1584_s19, %s1853_s19   ;;  %s1530_s18 = sphi %s1582_s18, %s1852_s18  }
   0x7   : > { %p42_p0 = scmp.ne.s32.totalorder %s1534_s19, %s1530_s18  ;;  %p1837_p1 = scmp.eq.s32.totalorder %s1603_s22, 0 }
   0x8   : > { %p156_p3 = scmp.eq.s32.totalorder %s1074_s23, 3  ;;  %p1075_p5 = scmp.ge.s32.totalorder %s1542_s21, 1 }
   0x9   : > { %p1612_p4 = por %p1837_p1, %p42_p0  ;;  %p163_p7 = scmp.lt.s32.totalorder %s1542_s21, 5 }
   0xa   : > { %p1617_p6 = por %p156_p3, %p42_p0  ;;  %s1544_s27 = smov [#allocation5]  }
   0xb   : > { %s1840_s24 = scalar_select %p1612_p4, 1, 0 }
   0xc   : > { %s1841_s25 = scalar_select %p1617_p6, 1, 0 }
   0xd   : > { %p1622_p8 = pnand %p1075_p5, %p163_p7  ;;  %s175_s28 = sshll.u32 %s1544_s27, 4  ;;  %s176_s28 = int_to_ptr.vmem [resolvable:$true] %s175_s28 }
   0xe   : > { %s1545_s30 = smov [#allocation7]   ;;  %s1386_s9 = scalar_lea.hbm %s1832_s1, 6272 }
   0xf   : > { %s1842_s26 = scalar_select %p1622_p8, 1, 0 }
  0x10   : > { %p1266_p9 = pneg %p1622_p8  ;;  %s191_s6 = sshll.u32 %s1545_s30, 4  ;;  %s1634_s6 = int_to_ptr.vmem [resolvable:$true] %s191_s6 }
  0x11   : > { %p1387_p11 = scmp.ne.s32.totalorder %s1832_s1, %s1386_s9  ;;  %p1393_p3 = scmp.lt.u32.totalorder %s1386_s9, %s1832_s1 }
  0x12   : > { %p1630_p10 = pnand %p1266_p9, %p1837_p1 }
  0x14   : > { %p1388_p12 = pneg %p1630_p10 }
  0x16   : > { %p1389_p13 = pnand %p1388_p12, %p1387_p11 }
  0x18   : > { %p1390_p0 = pneg %p1389_p13 }
  0x1a   : > { %p1395_p5 = pnand %p1393_p3, %p1390_p0 }
  0x1c   : > { %1398 = shalt.err (!%p1395_p5)
}
  0x1d   : > { %s1399_s14 = scalar_lea.vmem %s176_s28, 6272  ;;  %p1407_p2 = scmp.lt.s32.totalorder %s176_s28, %s176_s28 }
  0x1e   : > { %p1400_p7 = scmp.ne.s32.totalorder %s176_s28, %s1399_s14  ;;  %p1408_p6 = scmp.lt.s32.totalorder %s1399_s14, %s1399_s14 }
  0x20   : > { %p1402_p9 = pnand %p1400_p7, %p1388_p12  ;;  %p1409_p4 = por %p1408_p6, %p1407_p2 }
  0x22   : > { %p1403_p1 = pneg %p1402_p9 }
  0x24   : > { %p1410_p8 = pnand %p1409_p4, %p1403_p1 }
  0x26   : > { %1413 = shalt.err (!%p1410_p8)
}
  0x27   : > { %s1546_s15 = smov 64   ;;  %s1547_s16 = smov 4  }
  0x28   : > { %1269 = dma.hbm_to_vmem [thread:$0]  (!%p1630_p10), %s1832_s1, 6272, %s176_s28, [#allocation6], %s1546_s15, %s1546_s15, %s1547_s16  }
  0x29   : > { %s1414_s7 = scalar_lea.hbm %s1834_s3, 1024 }
  0x2a   : > { %p1415_p11 = scmp.ne.s32.totalorder %s1834_s3, %s1414_s7  ;;  %p1421_p4 = scmp.lt.u32.totalorder %s1414_s7, %s1834_s3 }
  0x2c   : > { %p1417_p1 = pnand %p1415_p11, %p1388_p12 }
  0x2e   : > { %p1418_p2 = pneg %p1417_p1 }
  0x30   : > { %p1423_p6 = pnand %p1421_p4, %p1418_p2 }
  0x32   : > { %1426 = shalt.err (!%p1423_p6)
}
  0x33   : > { %s1427_s28 = scalar_lea.vmem %s1634_s6, 1024  ;;  %p1435_p3 = scmp.lt.s32.totalorder %s1634_s6, %s1634_s6 }
  0x34   : > { %p1428_p8 = scmp.ne.s32.totalorder %s1634_s6, %s1427_s28  ;;  %p1436_p5 = scmp.lt.s32.totalorder %s1427_s28, %s1427_s28 }
  0x36   : > { %p1430_p13 = pnand %p1428_p8, %p1388_p12  ;;  %p1437_p7 = por %p1436_p5, %p1435_p3 }
  0x38   : > { %p1431_p0 = pneg %p1430_p13 }
  0x3a   : > { %p1438_p9 = pnand %p1437_p7, %p1431_p0 }
  0x3c   : > { %1441 = shalt.err (!%p1438_p9)
}
  0x3d   : > { %1272 = dma.hbm_to_vmem [thread:$0]  (!%p1630_p10), %s1834_s3, 1024, %s1634_s6, [#allocation6], %s1546_s15, %s1546_s15, %s1547_s16  }
  0x3e   : > { %s1684_s14 = sadd.s32 1, %s1542_s21   ;;  %s29_s29 = sadd.s32 1, %s1538_s20 }
  0x3f   : > { %s26_s17 = ssub.s32 %s1542_s21, %s1684_s14  ;;  %p36_p12 = scmp.ne.s32.totalorder %s1538_s20, %s1534_s19 }
  0x40   : > { %p27_p11 = scmp.eq.s32.totalorder %s26_s17, 0  ;;  %p37_p1 = scmp.eq.s32.totalorder %s1542_s21, 0 }
  0x41   : > { %p1844_p2 = scmp.eq.s32.totalorder %s1603_s22, 3  ;;  %p1283_p6 = scmp.lt.s32.totalorder %s1542_s21, 4 }
  0x42   : > { %s1700_s27 = scalar_select %p27_p11, %s1538_s20, %s29_s29  }
  0x43   : > { %p1694_p4 = por %p1844_p2, %p36_p12  ;;  %p38_p8 = por %p37_p1, %p36_p12 }
  0x44   : > { %s208_s30 = sand.u32 1, %s1538_s20   ;;  %s1252_s6 = smul.u32 896, %s1542_s21 }
  0x45   : > { %s1251_s7 = smul.u32 56, %s208_s30  ;;  %p1704_p10 = pnand %p1283_p6, %p38_p8 }
  0x46   : > { %s1711_s9 = scalar_lea.hbm %s1831_s0, %s1252_s6  ;;  %s209_s28 = scalar_lea.sflag [#allocation3], %s208_s30 }
  0x47   : > { %s212_s10 = scalar_lea.vmem [#allocation2], %s1251_s7  ;;  %s1442_s12 = scalar_lea.hbm %s1711_s9, 896 }
  0x48   : > { %s220_s11 = sshll.u32 %s212_s10, 4  ;;  %p1443_p13 = scmp.ne.s32.totalorder %s1711_s9, %s1442_s12  ;;  %s1713_s11 = int_to_ptr.vmem [resolvable:$true] %s220_s11 }
  0x49   : > { %p1444_p0 = pneg %p1704_p10  ;;  %s1447_s17 = scalar_lea.hbm %s1831_s0, 3584 }
  0x4a   : > { %p1448_p7 = scmp.lt.u32.totalorder %s1711_s9, %s1831_s0  ;;  %p1449_p9 = scmp.lt.u32.totalorder %s1447_s17, %s1442_s12 }
  0x4b   : > { %p1445_p3 = pnand %p1444_p0, %p1443_p13  ;;  %p1451_p11 = scmp.lt.u32.totalorder %s1442_s12, %s1711_s9 }
  0x4c   : > { %p1450_p12 = por %p1449_p9, %p1448_p7 }
  0x4d   : > { %p1446_p5 = pneg %p1445_p3 }
  0x4e   : > { %p1452_p1 = por %p1451_p11, %p1450_p12 }
  0x50   : > { %p1453_p2 = pnand %p1452_p1, %p1446_p5 }
  0x52   : > { %1456 = shalt.err (!%p1453_p2)
}
  0x53   : > { %s1457_s30 = scalar_lea.vmem %s1713_s11, 896  ;;  %s1548_s7 = smov [#allocation2]  }
  0x54   : > { %p1458_p6 = scmp.ne.s32.totalorder %s1713_s11, %s1457_s30  ;;  %s1462_s8 = sshll.u32 %s1548_s7, 4  ;;  %s1463_s8 = int_to_ptr.vmem [resolvable:$false] %s1462_s8 }
  0x55   : > { %s1464_s10 = scalar_lea.vmem %s1463_s8, 1792  ;;  %p1465_p3 = scmp.lt.s32.totalorder %s1713_s11, %s1463_s8 }
  0x56   : > { %p1460_p8 = pnand %p1458_p6, %p1444_p0  ;;  %p1466_p7 = scmp.lt.s32.totalorder %s1464_s10, %s1457_s30 }
  0x58   : > { %p1461_p13 = pneg %p1460_p8  ;;  %p1467_p9 = por %p1466_p7, %p1465_p3 }
  0x5a   : > { %p1468_p12 = pnand %p1467_p9, %p1461_p13 }
  0x5c   : > { %1471 = shalt.err (!%p1468_p12)
}
  0x5d   : > { %1276 = dma.hbm_to_vmem [thread:$0]  (!%p1704_p10), %s1711_s9, 896, %s1713_s11, %s209_s28  }
  0x5e   : > { %p1847_p5 = scmp.ne.s32.totalorder %s1842_s26, 0 }
  0x5f   : > { %s1743_s12 = sand.u32 (!%p1847_p5), 1, %s1534_s19   ;;  %p1848_p0 = scmp.ne.s32.totalorder (!%p1847_p5), %s1840_s24, 0 }
  0x60   : > { %229 = sbr.rel (%p1847_p5) target bundleno = 935 (0x3a7), region = 40  ;;  %s232_s29 = scalar_lea.sflag (!%p1847_p5), [#allocation3], %s1743_s12 }
  0x61   : > { %s1253_s13 = smul.u32 (!%p1847_p5), 56, %s1743_s12 }
  0x63   : > { %s1747_s17 = scalar_lea.vmem (!%p1847_p5), [#allocation2], %s1253_s13 }
  0x67   : > { %1517 = dma.done.wait (%p1848_p0), %s232_s29, 896  }
  0x68   : > { %1519 = vsyncadd (%p1848_p0), %s232_s29, 4294966400  ;;  %p1849_p10 = scmp.eq.s32.totalorder %s1603_s22, 0 }
  0x6a   : > { %1521 = dma.done.wait (%p1849_p10), [#allocation6], 7296   ;;  %p1850_p11 = pmov %p1849_p10 }
  0x6b   : > { %v1325_v0 = vld [vmem:[#allocation5 + $0x40] sm:$0xff]   ;;  %v1329_v4 = vld [vmem:[#allocation5 + $0x48] sm:$0xff]   ;;  %v1333_v8 = vld [vmem:[#allocation5 + $0x50] sm:$0xff]   ;;  %v1549_v44 = vmov 0.0   ;;  %vm1550_vm0 = vmmov 0   ;;  %vm684_vm1 = vcmask 130048  }
  0x6c   : > { %1523 = vsyncadd (%p1850_p11), [#allocation6], 4294960000  ;;  %v1326_v1 = vld [vmem:[#allocation5] sm:$0xff]   ;;  %1148 = vmatprep.subr.bf16.mxu0 %v1325_v0  ;;  %v1330_v5 = vld [vmem:[#allocation5 + $0x8] sm:$0xff]   ;;  %s1083_s11 = sshll.u32 %s1743_s12, 3  ;;  %s1145_s28 = sshll.u32 %s1603_s22, 7 }
  0x6d   : > { %v1327_v2 = vld [vmem:[#allocation5 + $0xc0] sm:$0xff]   ;;  %1149 = vmatpush3.bf16.msra.mxu0 %v1326_v1  ;;  %v1331_v6 = vld [vmem:[#allocation5 + $0xc8] sm:$0xff]   ;;  %v1334_v9 = vld [vmem:[#allocation5 + $0x10] sm:$0xff]   ;;  %s269_s6 = scalar_lea.vmem [#allocation8], %s1083_s11  ;;  %s1788_s8 = scalar_lea.hbm %s1836_s5, %s1145_s28 }
  0x6e   : > { %v1328_v3 = vld [vmem:[#allocation5 + $0x80] sm:$0xff]   ;;  %1170 = vmatprep.subr.bf16.mxu1 %v1327_v2  ;;  %1150 = vmatprep.subr.bf16.mxu0 %v1329_v4  ;;  %v1332_v7 = vld [vmem:[#allocation5 + $0x88] sm:$0xff]   ;;  %v1335_v10 = vld [vmem:[#allocation5 + $0xd0] sm:$0xff]   ;;  %s985_s16 = sshll.u32 %s269_s6, 4  ;;  %s972_s10 = scalar_lea.sflag [#allocation4], %s1743_s12  ;;  %s1790_s16 = int_to_ptr.vmem [resolvable:$true] %s985_s16 }
  0x6f   : > { %1171 = vmatpush3.bf16.msra.mxu1 %v1328_v3  ;;  %v1336_v11 = vld [vmem:[#allocation5 + $0x90] sm:$0xff]   ;;  %v1337_v12 = vld [vmem:[#allocation5 + $0x58] sm:$0xff]   ;;  %v1341_v16 = vld [vmem:[#allocation5 + $0x60] sm:$0xff]   ;;  %s1472_s13 = scalar_lea.vmem %s1790_s16, 128  ;;  %s1551_s22 = smov [#allocation8]  }
  0x70   : > { %1172 = vmatprep.subr.bf16.mxu1 %v1331_v6  ;;  %v1338_v13 = vld [vmem:[#allocation5 + $0x18] sm:$0xff]   ;;  %v1342_v17 = vld [vmem:[#allocation5 + $0x20] sm:$0xff]   ;;  %v1345_v20 = vld [vmem:[#allocation5 + $0x68] sm:$0xff]   ;;  %p1473_p1 = scmp.ne.s32.totalorder %s1790_s16, %s1472_s13  ;;  %s1476_s29 = sshll.u32 %s1551_s22, 4  ;;  %s1477_s29 = int_to_ptr.vmem [resolvable:$false] %s1476_s29 }
  0x71   : > { %1151 = vmatpush3.bf16.msra.mxu0 %v1330_v5  ;;  %v1339_v14 = vld [vmem:[#allocation5 + $0xd8] sm:$0xff]   ;;  %v1343_v18 = vld [vmem:[#allocation5 + $0xe0] sm:$0xff]   ;;  %v1346_v21 = vld [vmem:[#allocation5 + $0x28] sm:$0xff]   ;;  %p1479_p8 = scmp.lt.s32.totalorder %s1790_s16, %s1477_s29 }
  0x72   : > { %1152 = vmatprep.subr.bf16.mxu0 %v1333_v8  ;;  %v1340_v15 = vld [vmem:[#allocation5 + $0x98] sm:$0xff]   ;;  %v1344_v19 = vld [vmem:[#allocation5 + $0xa0] sm:$0xff]   ;;  %v1347_v22 = vld [vmem:[#allocation5 + $0xe8] sm:$0xff]   ;;  %p1474_p2 = pnand %p1473_p1, %p1694_p4 }
  0x73   : > { %1173 = vmatpush3.bf16.msra.mxu1 %v1332_v7  ;;  %v1348_v23 = vld [vmem:[#allocation5 + $0xa8] sm:$0xff]   ;;  %v1349_v24 = vld [vmem:[#allocation5 + $0x70] sm:$0xff]   ;;  %v1353_v28 = vld [vmem:[#allocation5 + $0x78] sm:$0xff]  }
  0x74   : > { %1174 = vmatprep.subr.bf16.mxu1 %v1335_v10  ;;  %v1350_v25 = vld [vmem:[#allocation5 + $0x30] sm:$0xff]   ;;  %v1354_v29 = vld [vmem:[#allocation5 + $0x38] sm:$0xff]   ;;  %v1357_v36 = vld [vmem:[#allocation5 + $0x140] sm:$0xff]   ;;  %p1475_p6 = pneg %p1474_p2 }
  0x75   : > { %1153 = vmatpush3.bf16.msra.mxu0 %v1334_v9  ;;  %v1351_v26 = vld [vmem:[#allocation5 + $0xf0] sm:$0xff]   ;;  %v1355_v30 = vld [vmem:[#allocation5 + $0xf8] sm:$0xff]   ;;  %v274_v37 = vld [vmem:[%s1747_s17 + $0x18] sm:$0xff] }
  0x76   : > { %1154 = vmatprep.subr.bf16.mxu0 %v1337_v12  ;;  %v1352_v27 = vld [vmem:[#allocation5 + $0xb0] sm:$0xff]   ;;  %v1356_v33 = vld [vmem:[#allocation5 + $0xb8] sm:$0xff]   ;;  %v281_v38 = vpack.c.bf16 %v274_v37, %v274_v37  ;;  %v1358_v39 = vld [vmem:[#allocation5 + $0x100] sm:$0xff]  }
  0x77   : > { %1175 = vmatpush3.bf16.msra.mxu1 %v1336_v11  ;;  %v272_v31 = vld [vmem:[%s1747_s17 + $0x8] sm:$0xff]  ;;  %v271_v34 = vld [vmem:[%s1747_s17] sm:$0xff]  ;;  %v273_v40 = vld [vmem:[%s1747_s17 + $0x10] sm:$0xff] }
  0x78   : > { %1176 = vmatprep.subr.bf16.mxu1 %v1339_v14  ;;  %v279_v32 = vpack.c.bf16 %v272_v31, %v272_v31  ;;  %v278_v35 = vpack.c.bf16 %v271_v34, %v271_v34  ;;  %760 = vmatprep.mubr.bf16.mxu1 %v281_v38  ;;  %v280_v41 = vpack.c.bf16 %v273_v40, %v273_v40  ;;  %v1359_v42 = vld [vmem:[#allocation5 + $0x148] sm:$0xff]   ;;  %v1361_v45 = vld [vmem:[#allocation5 + $0x150] sm:$0xff]   ;;  %v1363_v47 = vld [vmem:[#allocation5 + $0x158] sm:$0xff]  }
  0x79   : > { %1155 = vmatpush3.bf16.msra.mxu0 %v1338_v13  ;;  %v1360_v43 = vld [vmem:[#allocation5 + $0x108] sm:$0xff]   ;;  %v1362_v46 = vld [vmem:[#allocation5 + $0x110] sm:$0xff]   ;;  %v1364_v48 = vld [vmem:[#allocation5 + $0x118] sm:$0xff]  }
  0x7a   : > { %1156 = vmatprep.subr.bf16.mxu0 %v1341_v16  ;;  %720 = vmatprep.mubr.bf16.mxu0 %v279_v32  ;;  %v1365_v49 = vld [vmem:[#allocation5 + $0x160] sm:$0xff]   ;;  %v1367_v51 = vld [vmem:[#allocation5 + $0x168] sm:$0xff]   ;;  %v276_v54 = vld [vmem:[%s1747_s17 + $0x28] sm:$0xff] }
  0x7b   : > { %1177 = vmatpush3.bf16.msra.mxu1 %v1340_v15  ;;  %v1366_v50 = vld [vmem:[#allocation5 + $0x120] sm:$0xff]   ;;  %v1368_v52 = vld [vmem:[#allocation5 + $0x128] sm:$0xff]   ;;  %v1369_v55 = vld [vmem:[#allocation5 + $0x170] sm:$0xff]   ;;  %v283_v56 = vpack.c.bf16 %v276_v54, %v276_v54 }
  0x7c   : > { %1178 = vmatprep.subr.bf16.mxu1 %v1343_v18  ;;  %v1373_v53 = vld [vmem:[#allocation5 + $0x180] sm:$0xff]   ;;  %v1370_v59 = vld [vmem:[#allocation5 + $0x130] sm:$0xff]   ;;  %v1371_v60 = vld [vmem:[#allocation5 + $0x178] sm:$0xff]  }
  0x7d   : > { %1157 = vmatpush3.bf16.msra.mxu0 %v1342_v17  ;;  %v277_v57 = vld [vmem:[%s1747_s17 + $0x30] sm:$0xff]  ;;  %v275_v62 = vld [vmem:[%s1747_s17 + $0x20] sm:$0xff]  ;;  %s1478_s17 = scalar_lea.vmem %s1477_s29, 256 }
  0x7e   : > { %1158 = vmatprep.subr.bf16.mxu0 %v1345_v20  ;;  %v284_v58 = vpack.c.bf16 %v277_v57, %v277_v57  ;;  %v1372_v61 = vld [vmem:[#allocation5 + $0x138] sm:$0xff]   ;;  %v282_v63 = vpack.c.bf16 %v275_v62, %v275_v62  ;;  %v1374_v0 = vld [vmem:[#allocation7] sm:$0xff]   ;;  %v1375_v1 = vld [vmem:[#allocation7 + $0x8] sm:$0xff]   ;;  %p1480_p13 = scmp.lt.s32.totalorder %s1478_s17, %s1472_s13 }
  0x7f   : > { %1179 = vmatpush3.bf16.msra.mxu1 %v1344_v19  ;;  %v1376_v2 = vld [vmem:[#allocation7 + $0x10] sm:$0xff]   ;;  %v1377_v3 = vld [vmem:[#allocation7 + $0x18] sm:$0xff]   ;;  %v1378_v4 = vld [vmem:[#allocation7 + $0x20] sm:$0xff]  }
  0x80   : > { %1180 = vmatprep.subr.bf16.mxu1 %v1347_v22  ;;  %v1379_v5 = vld [vmem:[#allocation7 + $0x28] sm:$0xff]   ;;  %v1380_v6 = vld [vmem:[#allocation7 + $0x30] sm:$0xff]   ;;  %v1381_v7 = vld [vmem:[#allocation7 + $0x38] sm:$0xff]   ;;  %p1481_p3 = por %p1480_p13, %p1479_p8 }
  0x81   : > { %1159 = vmatpush3.bf16.msra.mxu0 %v1346_v21  ;;  %v1084_v9 = vld [vmem:[%s1833_s2] ss:$0 sm:$0xff] }
  0x82   : > { %1160 = vmatprep.subr.bf16.mxu0 %v1349_v24  ;;  %v1135_v34 = vld [vmem:[%s1835_s4] ss:$0 sm:$0xff]  ;;  %p1482_p7 = pnand %p1481_p3, %p1475_p6 }
  0x83   : > { %1181 = vmatpush3.bf16.msra.mxu1 %v1348_v23 }
  0x84   : > { %1182 = vmatprep.subr.bf16.mxu1 %v1351_v26 }
  0x85   : > { %1161 = vmatpush3.bf16.msra.mxu0 %v1350_v25 }
  0x86   : > { %1162 = vmatprep.subr.bf16.mxu0 %v1353_v28 }
  0x87   : > { %1183 = vmatpush3.bf16.msra.mxu1 %v1352_v27 }
  0x88   : > { %1184 = vmatprep.subr.bf16.mxu1 %v1355_v30 }
  0x89   : > { %1163 = vmatpush3.bf16.msra.mxu0 %v1354_v29 }
  0x8a   : > { %1192 = vmatprep.subr.bf16.mxu0 %v1357_v36 }
  0x8b   : > { %1185 = vmatpush3.bf16.msra.mxu1 %v1356_v33 }
  0x8c   : > { %721 = vmatmul.mubr.bf16.vlgmr.msra.gmra.mrb[0].mxu0 %v278_v35  ;;  %1225 = vmatprep.subr.bf16.mxu1 %v1549_v44 }
  0x8d   : > { %1193 = vmatpush3.bf16.msra.mxu0 %v1358_v39  ;;  %800 = vmatprep.mubr.bf16.mxu0 %v283_v56 }
  0x8e   : > { %761 = vmatmul.mubr.bf16.vlgmr.msra.gmra.mrb[0].mxu1 %v280_v41  ;;  %1194 = vmatprep.subr.bf16.mxu0 %v1359_v42 }
  0x8f   : > { %1227 = vmatprep.mubr.msk.bf16.mxu1 %vm1550_vm0, %v1549_v44  ;;  %1226 = vmatpush3.bf16.msra.mxu1 %v1373_v53 }
  0x90   : > { %1231 = vmatprep.subr.bf16.mxu1 %v1549_v44 }
  0x91   : > { %1195 = vmatpush3.bf16.msra.mxu0 %v1360_v43 }
  0x92   : > { %1196 = vmatprep.subr.bf16.mxu0 %v1361_v45 }
  0x95   : > { %1197 = vmatpush3.bf16.msra.mxu0 %v1362_v46 }
  0x96   : > { %1198 = vmatprep.subr.bf16.mxu0 %v1363_v47  ;;  %1228 = vmatmul.mubr.msk.bf16.vlgmr.msra.gmra.mrb[4].mxu1 %vm684_vm1, %v284_v58 }
  0x97   : > { %1247 = vmatprep.mubr.msk.bf16.mxu1 %vm1550_vm0, %v1549_v44  ;;  %1232 = vmatpush3.bf16.msra.mxu1 %v1374_v0 }
  0x98   : > { %1233 = vmatprep.subr.bf16.mxu1 %v1549_v44 }
  0x99   : > { %1199 = vmatpush3.bf16.msra.mxu0 %v1364_v48 }
  0x9a   : > { %1200 = vmatprep.subr.bf16.mxu0 %v1365_v49 }
  0x9b   : > { %1234 = vmatpush3.bf16.msra.mxu1 %v1375_v1 }
  0x9c   : > { %1235 = vmatprep.subr.bf16.mxu1 %v1549_v44 }
  0x9d   : > { %1201 = vmatpush3.bf16.msra.mxu0 %v1366_v50 }
  0x9e   : > { %1202 = vmatprep.subr.bf16.mxu0 %v1367_v51 }
  0x9f   : > { %1236 = vmatpush3.bf16.msra.mxu1 %v1376_v2 }
  0xa0   : > { %1237 = vmatprep.subr.bf16.mxu1 %v1549_v44 }
  0xa1   : > { %1203 = vmatpush3.bf16.msra.mxu0 %v1368_v52 }
  0xa2   : > { %1204 = vmatprep.subr.bf16.mxu0 %v1369_v55 }
  0xa3   : > { %1238 = vmatpush3.bf16.msra.mxu1 %v1377_v3 }
  0xa4   : > { %1239 = vmatprep.subr.bf16.mxu1 %v1549_v44 }
  0xa5   : > { %1205 = vmatpush3.bf16.msra.mxu0 %v1370_v59 }
  0xa6   : > { %1206 = vmatprep.subr.bf16.mxu0 %v1371_v60 }
  0xa7   : > { %1240 = vmatpush3.bf16.msra.mxu1 %v1378_v4 }
  0xa8   : > { %1241 = vmatprep.subr.bf16.mxu1 %v1549_v44 }
  0xa9   : > { %1207 = vmatpush3.bf16.msra.mxu0 %v1372_v61 }
  0xab   : > { %1242 = vmatpush3.bf16.msra.mxu1 %v1379_v5 }
  0xac   : > { %801 = vmatmul.mubr.bf16.vlgmr.msra.gmra.mrb[4].mxu0 %v282_v63  ;;  %1243 = vmatprep.subr.bf16.mxu1 %v1549_v44 }
  0xaf   : > { %1244 = vmatpush3.bf16.msra.mxu1 %v1380_v6 }
  0xb0   : > { %1245 = vmatprep.subr.bf16.mxu1 %v1549_v44 }
  0xb3   : > { %1246 = vmatpush3.bf16.msra.mxu1 %v1381_v7 }
 0x15f   : > { %v1164_v8 = vpop.f32.mrb[0].mxu0 }
 0x160   : > { %v1165_v10 = vpop.f32.mrb[1].mxu0 }
 0x161   : > { %v1166_v11 = vadd.f32 %v1165_v10, %v1164_v8  ;;  %v1167_v12 = vpop.f32.mrb[2].mxu0  ;;  %v1186_v13 = vpop.f32.mrb[0].mxu1 }
 0x162   : > { %v1168_v14 = vpop.f32.mrb[3].mxu0  ;;  %v1187_v16 = vpop.f32.mrb[1].mxu1 }
 0x163   : > { %v723_v15 = vadd.f32 %v1166_v11, %v1084_v9  ;;  %v1188_v17 = vadd.f32 %v1187_v16, %v1186_v13  ;;  %v1189_v18 = vpop.f32.mrb[2].mxu1 }
 0x164   : > { %v1190_v19 = vpop.f32.mrb[3].mxu1 }
 0x165   : > { %v763_v20 = vadd.f32 %v1188_v17, %v723_v15 }
 0x169   : > { %v842_v21 = vpop.f32.mrb[4].mxu1 }
 0x16a   : > { %v1229_v22 = vpop.f32.mrb[5].mxu1 }
 0x16b   : > { %v845_v23 = vpop.f32.mrb[6].mxu1 }
 0x16c   : > { %v1230_v24 = vpop.f32.mrb[7].mxu1 }
 0x17f   : > { %v1208_v25 = vpop.f32.mrb[4].mxu0 }
 0x180   : > { %v1209_v26 = vpop.f32.mrb[5].mxu0 }
 0x181   : > { %v1210_v27 = vadd.f32 %v1209_v26, %v1208_v25  ;;  %v1211_v28 = vpop.f32.mrb[6].mxu0 }
 0x182   : > { %v1212_v29 = vpop.f32.mrb[7].mxu0 }
 0x183   : > { %v803_v30 = vadd.f32 %v1210_v27, %v763_v20 }
 0x185   : > { %v843_v31 = vadd.f32 %v842_v21, %v803_v30 }
 0x187   : > { %v848_v32 = vmax.f32 %v843_v31, 0.0 }
 0x189   : > { %v849_v33 = vpack.c.bf16 %v848_v32, %v848_v32 }
 0x18b   : > { %1248 = vmatmul.mubr.bf16.vlgmr.msra.gmra.mrb[8].mxu1 %v849_v33 }
 0x25e   : > { %v955_v35 = vpop.f32.mrb[8].mxu1 }
 0x25f   : > { %v956_v36 = vadd.f32 %v1135_v34, %v955_v35  ;;  %v1249_v37 = vpop.f32.mrb[9].mxu1 }
 0x260   : > { %v958_v38 = vpop.f32.mrb[10].mxu1 }
 0x261   : > { %961 = vmax.xlane.f32.xlu0 %v956_v36  ;;  %v1250_v39 = vpop.f32.mrb[11].mxu1 }
 0x2ee   : > { %v962_v40 = vpop.xlane.xlu0 %961 }
 0x2ef   : > { %v963_v41 = vsub.f32 %v956_v36, %v962_v40 }
 0x2f1   : > { %v964_v42 = vmul.f32 1.442695, %v963_v41 }
 0x2f3   : > { %1382 = vpow2.f32 %v964_v42 }
 0x2fd   : > { %v1383_v43 = vpop.eup %1382 }
 0x2fe   : > { %966 = vadd.xlane.f32.xlu0 %v1383_v43 }
 0x38b   : > { %v967_v44 = vpop.xlane.xlu0 %966 }
 0x38c   : > { %1384 = vrcp.f32 %v967_v44 }
 0x396   : > { %v1385_v45 = vpop.eup %1384 }
 0x397   : > { %v969_v46 = vmul.f32 %v1385_v45, %v1383_v43 }
 0x399   : > { %970 = vst [vmem:[%s269_s6] sm:$0xff] %v969_v46 }
 0x39a   : > { %1485 = shalt.err (!%p1482_p7)
}
 0x39b   : > { %s1486_s12 = scalar_lea.hbm %s1788_s8, 128  ;;  %s1490_s15 = scalar_lea.hbm %s1836_s5, 512 }
 0x39c   : > { %p1487_p9 = scmp.ne.s32.totalorder %s1788_s8, %s1486_s12  ;;  %p1491_p0 = scmp.lt.u32.totalorder %s1788_s8, %s1836_s5 }
 0x39d   : > { %p1492_p10 = scmp.lt.u32.totalorder %s1490_s15, %s1486_s12  ;;  %p1494_p1 = scmp.lt.u32.totalorder %s1486_s12, %s1788_s8 }
 0x39e   : > { %p1488_p12 = pnand %p1487_p9, %p1694_p4 }
 0x39f   : > { %p1493_p11 = por %p1492_p10, %p1491_p0 }
 0x3a0   : > { %p1489_p5 = pneg %p1488_p12 }
 0x3a1   : > { %p1495_p2 = por %p1494_p1, %p1493_p11 }
 0x3a3   : > { %p1496_p6 = pnand %p1495_p2, %p1489_p5 }
 0x3a5   : > { %1499 = shalt.err (!%p1496_p6)
}
 0x3a6   : > { %1264 = dma.vmem_to_hbm [thread:$0]  (%p1694_p4), %s1790_s16, 128, %s1788_s8, %s972_s10  }
 0x3a7 PF: > { %p1286_p8 = scmp.ge.s32.totalorder %s1542_s21, 2  ;;  %s997_s28 = sand.u32 1, %s1530_s18  }
 0x3a8   : > { %p1851_p13 = scmp.ne.s32.totalorder %s1841_s25, 0  ;;  %s998_s6 = scalar_lea.sflag [#allocation4], %s997_s28 }
 0x3aa   : > { %p1278_p3 = pnand %p1286_p8, %p1851_p13 }
 0x3ac   : > { %1525 = dma.done.wait (!%p1278_p3), %s998_s6, 128  }
 0x3ad   : > { %1527 = vsyncadd (!%p1278_p3), %s998_s6, 4294967168  ;;  %p19_p7 = scmp.ge.s32.totalorder %s1684_s14, 6   ;;  %s1852_s18 = smov %s1534_s19 }
 0x3ae   : > { %s1853_s19 = smov %s1538_s20  ;;  %s1854_s20 = smov %s1700_s27 }
 0x3af   : > { %s1855_s21 = smov %s1684_s14  ;;  %21 = sbr.rel (!%p19_p7) target bundleno = 6 (0x6), region = 93 }
 0x3b6   :  { %1003 = vsyncpa [#allocation3], 1 }
 0x3b7   :  { %1005 = vsyncpa [#allocation3 + $0x1], 1 }
 0x3b8   :  { %1006 = vsyncpa [#allocation6], 1 }
 0x3b9   :  { %1007 = vsyncpa [#allocation4], 1 }
 0x3ba   :  { %1009 = vsyncpa [#allocation4 + $0x1], 1 }

</bundles_post_ra>
